<compile_context>
chip_gen: v7x
topology: tpu7x:2x2x1
jax: 0.10.0
libtpu: 0.0.40
codegen_flags: <defaults>
</compile_context>

<pallas_src>
import functools

import jax
import jax.numpy as jnp
from jax.experimental import pallas as pl
from jax.experimental.pallas import tpu as pltpu


def _mlp_kernel(xt_ref, w01_ref, b1_ref, w2_ref, b2_ref, ot_ref):
    # xt_ref : (type_dim, tile_rows)  bf16  -- node features, transposed (rows on lanes)
    # w01_ref: (hidden, type_dim)     bf16  -- fused W1 @ We (embedding folded into conv1)
    # b1_ref : (hidden, 1)            f32
    # w2_ref : (out_ch, hidden)       bf16  -- conv2 weight, native (out, in) layout
    # b2_ref : (out_ch, 1)            f32
    # ot_ref : (out_ch, tile_rows)    f32   -- out^T, lane-dense stores
    h1 = jnp.dot(w01_ref[...], xt_ref[...], preferred_element_type=jnp.float32)
    h1 = jnp.maximum(h1 + b1_ref[...], 0.0)                       # ReLU; dropout == identity (eval)
    out = jnp.dot(w2_ref[...], h1.astype(w2_ref.dtype),
                  preferred_element_type=jnp.float32)
    ot_ref[...] = (out + b2_ref[...]).astype(ot_ref.dtype)


@functools.partial(jax.jit, static_argnames=("tile_rows",))
def mlp_forward(x, we, w1, b1, w2, b2, *, tile_rows=512):
    """Fused MLP forward (eval mode: dropout == identity).

    x  : (N, type_dim) f32 node features
    we : (dim, type_dim)   -- x_embddings.weight  (PyTorch (out, in) layout, bias=False)
    w1 : (hidden, dim)     -- conv1.weight
    b1 : (hidden,)         -- conv1.bias
    w2 : (out_ch, hidden)  -- conv2.weight
    b2 : (out_ch,)         -- conv2.bias
    returns (N, out_ch) f32
    """
    n, type_dim = x.shape
    hidden = w1.shape[0]
    out_ch = w2.shape[0]
    assert tile_rows % 128 == 0, "tile_rows must be a multiple of the 128-lane width"

    # (1) Fold the bias-free embedding Linear into conv1:  (x@We^T)@W1^T == x@(W1@We)^T
    w01 = w1.astype(jnp.float32) @ we.astype(jnp.float32)          # (hidden, type_dim)

    # (2)/(3) Lane-dense transposed layout + ragged-N handling via padding.
    grid_n = pl.cdiv(n, tile_rows)
    n_pad = grid_n * tile_rows
    xt = x.T.astype(jnp.bfloat16)                                  # (type_dim, N)
    if n_pad != n:
        xt = jnp.pad(xt, ((0, 0), (0, n_pad - n)))                 # zero cols -> dropped later

    # (4) bf16 HBM/MXU-input path, f32 biases + accumulation.
    w01_b = w01.astype(jnp.bfloat16)
    w2_b = w2.astype(jnp.bfloat16)
    b1_c = b1.reshape(hidden, 1).astype(jnp.float32)
    b2_c = b2.reshape(out_ch, 1).astype(jnp.float32)

    # (5) Advisory cost estimate (post-fusion FLOPs, bf16 inputs / f32 output).
    flops = 2 * n_pad * (type_dim * hidden + hidden * out_ch)
    bytes_accessed = (xt.size * 2 + w01_b.size * 2 + w2_b.size * 2
                      + b1_c.size * 4 + b2_c.size * 4 + out_ch * n_pad * 4)

    out_t = pl.pallas_call(
        _mlp_kernel,
        out_shape=jax.ShapeDtypeStruct((out_ch, n_pad), jnp.float32),
        grid_spec=pltpu.PrefetchScalarGridSpec(
            num_scalar_prefetch=0,
            grid=(grid_n,),
            in_specs=[
                pl.BlockSpec((type_dim, tile_rows), lambda i: (0, i)),
                pl.BlockSpec((hidden, type_dim), lambda i: (0, 0)),
                pl.BlockSpec((hidden, 1), lambda i: (0, 0)),
                pl.BlockSpec((out_ch, hidden), lambda i: (0, 0)),
                pl.BlockSpec((out_ch, 1), lambda i: (0, 0)),
            ],
            out_specs=pl.BlockSpec((out_ch, tile_rows), lambda i: (0, i)),
        ),
        compiler_params=pltpu.CompilerParams(
            dimension_semantics=("parallel",),
        ),
        cost_estimate=pl.CostEstimate(
            flops=flops, transcendentals=0, bytes_accessed=bytes_accessed),
    )(xt, w01_b, b1_c, w2_b, b2_c)

    # Back to PyTorch's (N, out_ch) row-major layout; drop row padding.
    return out_t.T[:n]


def _xavier_uniform(key, shape):
    fan_out, fan_in = shape
    limit = jnp.sqrt(6.0 / (fan_in + fan_out))
    return jax.random.uniform(key, shape, jnp.float32, -limit, limit)


if __name__ == "__main__":
    # config: type_dim=16, dim=32, hidden_channels=64, out_channels=8,
    #         num_node=None (embedding Linear path), dropout inactive (eval).
    # N=300 exercises the ragged-N padding path; tile_rows=128 keeps grid=3 small
    # for the test (default 512 for real workloads).
    N, TYPE_DIM, DIM, HIDDEN, OUT = 300, 16, 32, 64, 8
    TILE_ROWS = 128

    key = jax.random.PRNGKey(0)
    k_x, k_we, k_w1, k_b1, k_w2, k_b2 = jax.random.split(key, 6)

    x = jax.random.normal(k_x, (N, TYPE_DIM), jnp.float32)

    # PyTorch nn.Linear weights in their native (out_features, in_features) layout.
    we = _xavier_uniform(k_we, (DIM, TYPE_DIM))        # x_embddings (bias=False)
    w1 = _xavier_uniform(k_w1, (HIDDEN, DIM))          # conv1
    b1 = 0.01 * jax.random.normal(k_b1, (HIDDEN,), jnp.float32)
    w2 = _xavier_uniform(k_w2, (OUT, HIDDEN))          # conv2
    b2 = 0.01 * jax.random.normal(k_b2, (OUT,), jnp.float32)

    out = jax.block_until_ready(
        mlp_forward(x, we, w1, b1, w2, b2, tile_rows=TILE_ROWS))
    assert out.shape == (N, OUT)

    # Reference 1: exact f32, un-fused module semantics (dropout identity in eval).
    ref_f32 = jnp.maximum((x @ we.T) @ w1.T + b1, 0.0) @ w2.T + b2

    # Reference 2: emulate the kernel's bf16 cast points (tight check).
    xb = x.astype(jnp.bfloat16).astype(jnp.float32)
    w01b = (w1 @ we).astype(jnp.bfloat16).astype(jnp.float32)
    w2b = w2.astype(jnp.bfloat16).astype(jnp.float32)
    h1 = jnp.maximum(xb @ w01b.T + b1, 0.0).astype(jnp.bfloat16).astype(jnp.float32)
    ref_bf16 = h1 @ w2b.T + b2

    assert jnp.allclose(out, ref_bf16, atol=2e-3, rtol=2e-3), \
        float(jnp.max(jnp.abs(out - ref_bf16)))
    assert jnp.allclose(out, ref_f32, atol=3e-2, rtol=3e-2), \
        float(jnp.max(jnp.abs(out - ref_f32)))

    print("KERNEL_OK")
</pallas_src>

<mosaic_0001>
module attributes {stable_mosaic.version = 11 : i64} {
  func.func @_mlp_kernel(%arg0: i32, %arg1: memref<16x128xbf16, #tpu.memory_space<vmem>>, %arg2: memref<64x16xbf16, #tpu.memory_space<vmem>>, %arg3: memref<64x1xf32, #tpu.memory_space<vmem>>, %arg4: memref<8x64xbf16, #tpu.memory_space<vmem>>, %arg5: memref<8x1xf32, #tpu.memory_space<vmem>>, %arg6: memref<8x128xf32, #tpu.memory_space<vmem>>) attributes {dimension_semantics = [#tpu.dimension_semantics<parallel>], iteration_bounds = array<i64: 3>, scalar_prefetch = 0 : i64, scratch_operands = 0 : i64, tpu.core_type = #tpu.core_type<tc>, window_params = [{transform_indices = @transform_0, window_bounds = array<i64: 16, 128>}, {pipeline_mode = #tpu.pipeline_mode<synchronous>, transform_indices = @transform_1, window_bounds = array<i64: 64, 16>}, {pipeline_mode = #tpu.pipeline_mode<synchronous>, transform_indices = @transform_2, window_bounds = array<i64: 64, 1>}, {pipeline_mode = #tpu.pipeline_mode<synchronous>, transform_indices = @transform_3, window_bounds = array<i64: 8, 64>}, {pipeline_mode = #tpu.pipeline_mode<synchronous>, transform_indices = @transform_4, window_bounds = array<i64: 8, 1>}, {transform_indices = @transform_5, window_bounds = array<i64: 8, 128>}]} {
    %c0 = arith.constant 0 : index
    %c0_0 = arith.constant 0 : index
    %0 = vector.load %arg2[%c0, %c0_0] : memref<64x16xbf16, #tpu.memory_space<vmem>>, vector<64x16xbf16>
    %c0_1 = arith.constant 0 : index
    %c0_2 = arith.constant 0 : index
    %1 = vector.load %arg1[%c0_1, %c0_2] : memref<16x128xbf16, #tpu.memory_space<vmem>>, vector<16x128xbf16>
    %cst = arith.constant dense<0.000000e+00> : vector<64x128xf32>
    %2 = tpu.matmul %0, %1, %cst {dimension_numbers = #tpu.dot_dimension_numbers<[1], [0], [0], [1], [0, 0, 1, 1], [], []>} : vector<64x16xbf16>, vector<16x128xbf16>, vector<64x128xf32> -> vector<64x128xf32>
    %c0_3 = arith.constant 0 : index
    %c0_4 = arith.constant 0 : index
    %3 = vector.load %arg3[%c0_3, %c0_4] : memref<64x1xf32, #tpu.memory_space<vmem>>, vector<64x1xf32>
    %4 = vector.broadcast %3 : vector<64x1xf32> to vector<64x128xf32>
    %5 = arith.addf %2, %4 : vector<64x128xf32>
    %cst_5 = arith.constant 0.000000e+00 : f32
    %6 = vector.broadcast %cst_5 : f32 to vector<64x128xf32>
    %7 = arith.maximumf %5, %6 : vector<64x128xf32>
    %c0_6 = arith.constant 0 : index
    %c0_7 = arith.constant 0 : index
    %8 = vector.load %arg4[%c0_6, %c0_7] : memref<8x64xbf16, #tpu.memory_space<vmem>>, vector<8x64xbf16>
    %9 = arith.truncf %7 : vector<64x128xf32> to vector<64x128xbf16>
    %cst_8 = arith.constant dense<0.000000e+00> : vector<8x128xf32>
    %10 = tpu.matmul %8, %9, %cst_8 {dimension_numbers = #tpu.dot_dimension_numbers<[1], [0], [0], [1], [0, 0, 1, 1], [], []>} : vector<8x64xbf16>, vector<64x128xbf16>, vector<8x128xf32> -> vector<8x128xf32>
    %c0_9 = arith.constant 0 : index
    %c0_10 = arith.constant 0 : index
    %11 = vector.load %arg5[%c0_9, %c0_10] : memref<8x1xf32, #tpu.memory_space<vmem>>, vector<8x1xf32>
    %12 = vector.broadcast %11 : vector<8x1xf32> to vector<8x128xf32>
    %13 = arith.addf %10, %12 : vector<8x128xf32>
    %c0_11 = arith.constant 0 : index
    %c0_12 = arith.constant 0 : index
    %14 = vector.load %arg6[%c0_11, %c0_12] : memref<8x128xf32, #tpu.memory_space<vmem>>, vector<8x128xf32>
    tpu.vector_store %arg6[%c0_11, %c0_12], %13 {strides = array<i32>} : memref<8x128xf32, #tpu.memory_space<vmem>>, vector<8x128xf32>,
    return
  }
  func.func @transform_0(%arg0: i32) -> (i32, i32) {
    %c0_i32 = arith.constant 0 : i32
    %c0_i32_0 = arith.constant 0 : i32
    return %c0_i32, %arg0 : i32, i32
  }
  func.func @transform_1(%arg0: i32) -> (i32, i32) {
    %c0_i32 = arith.constant 0 : i32
    %c0_i32_0 = arith.constant 0 : i32
    %c0_i32_1 = arith.constant 0 : i32
    return %c0_i32, %c0_i32_0 : i32, i32
  }
  func.func @transform_2(%arg0: i32) -> (i32, i32) {
    %c0_i32 = arith.constant 0 : i32
    %c0_i32_0 = arith.constant 0 : i32
    %c0_i32_1 = arith.constant 0 : i32
    return %c0_i32, %c0_i32_0 : i32, i32
  }
  func.func @transform_3(%arg0: i32) -> (i32, i32) {
    %c0_i32 = arith.constant 0 : i32
    %c0_i32_0 = arith.constant 0 : i32
    %c0_i32_1 = arith.constant 0 : i32
    return %c0_i32, %c0_i32_0 : i32, i32
  }
  func.func @transform_4(%arg0: i32) -> (i32, i32) {
    %c0_i32 = arith.constant 0 : i32
    %c0_i32_0 = arith.constant 0 : i32
    %c0_i32_1 = arith.constant 0 : i32
    return %c0_i32, %c0_i32_0 : i32, i32
  }
  func.func @transform_5(%arg0: i32) -> (i32, i32) {
    %c0_i32 = arith.constant 0 : i32
    %c0_i32_0 = arith.constant 0 : i32
    return %c0_i32, %arg0 : i32, i32
  }
}

</mosaic_0001>

<bundles_post_ra>
// kernel: mlp_forward.1
= control target key start
LH: loop header
LB: loop body
LE: loop exit
PB: predicated region body
PF: predicated region fallthrough
CT: control target
= control target key end

     0   :  { %10 = vsyncpa [#allocation4], 0  ;;  %s931_s0 = inlined_call_operand.vmem [shape: bf16[16,384], index: 0, kind: input, shape index: {}]   ;;  %s932_s1 = inlined_call_operand.vmem [shape: bf16[64,16], index: 1, kind: input, shape index: {}]   ;;  %s933_s2 = inlined_call_operand.vmem [shape: f32[64,1], index: 2, kind: input, shape index: {}]   ;;  %s934_s3 = inlined_call_operand.vmem [shape: bf16[8,64], index: 3, kind: input, shape index: {}]   ;;  %s935_s4 = inlined_call_operand.vmem [shape: f32[8,1], index: 4, kind: input, shape index: {}]   ;;  %s936_s5 = inlined_call_operand.hbm [shape: f32[8,384], index: 5, kind: output, shape index: {}]  }
   0x1   :  { %12 = vsyncpa [#allocation4 + $0x1], 0  ;;  %s775_s18 = smov 0   ;;  %s777_s19 = smov 0  }
   0x2   :  { %s779_s20 = smov 0   ;;  %s781_s21 = smov 0  }
   0x3 LB: > { %s573_s22 = sadd.s32 4294967295, %s739_s21   ;;  %s574_s23 = sadd.s32 4294967294, %s739_s21   ;;  %s739_s21 = sphi %s781_s21, %s942_s21   ;;  %s735_s20 = sphi %s779_s20, %s941_s20   ;;  %s731_s19 = sphi %s777_s19, %s940_s19   ;;  %s727_s18 = sphi %s775_s18, %s939_s18  }
   0x4   : > { %s798_s24 = sadd.s32 1, %s739_s21   ;;  %s25_s25 = sadd.s32 1, %s735_s20 }
   0x5   : > { %s22_s26 = ssub.s32 %s739_s21, %s798_s24  ;;  %p32_p0 = scmp.ne.s32.totalorder %s735_s20, %s731_s19 }
   0x6   : > { %p23_p1 = scmp.eq.s32.totalorder %s22_s26, 0  ;;  %p33_p2 = scmp.eq.s32.totalorder %s739_s21, 0 }
   0x7   : > { %p146_p3 = scmp.eq.s32.totalorder %s573_s22, 2  ;;  %p151_p4 = scmp.ne.s32.totalorder %s731_s19, %s727_s18 }
   0x8   : > { %s811_s27 = scalar_select %p23_p1, %s735_s20, %s25_s25  }
   0x9   : > { %p34_p5 = por %p33_p2, %p32_p0  ;;  %p813_p6 = por %p146_p3, %p32_p0 }
   0xa   : > { %p152_p7 = scmp.eq.s32.totalorder %s574_s23, 2  ;;  %p576_p9 = scmp.ge.s32.totalorder %s739_s21, 3 }
   0xc   : > { %p817_p8 = por %p152_p7, %p151_p4  ;;  %180 = sbr.rel (%p576_p9) target bundleno = 26 (0x1a), region = 32 }
  0x13   : > { %183 = sbr.rel (!%p34_p5) target bundleno = 26 (0x1a), region = 36  ;;  %s185_s30 = sand.u32 (%p34_p5), 1, %s735_s20  }
  0x14   : > { %s578_s6 = sshll.u32 (%p34_p5), %s739_s21, 2  ;;  %s577_s7 = sshll.u32 (%p34_p5), %s185_s30, 3 }
  0x15   : > { %s189_s10 = scalar_lea.vmem (%p34_p5), %s931_s0, %s578_s6  ;;  %s187_s11 = scalar_lea.vmem (%p34_p5), [#allocation2], %s577_s7 }
  0x16   : > { %v205_v0 = vld [vmem:[%s189_s10] sm:$0xf] (%p34_p5)  ;;  %v207_v1 = vld [vmem:[%s189_s10 + $0xc] sm:$0xf] (%p34_p5) }
  0x17   : > { %206 = vst [vmem:[%s187_s11] sm:$0xf] (%p34_p5), %v205_v0  ;;  %208 = vst [vmem:[%s187_s11 + $0x4] sm:$0xf] (%p34_p5), %v207_v1 }
  0x1a PF: > { %p579_p10 = scmp.ge.s32.totalorder %s739_s21, 1  ;;  %p234_p11 = scmp.lt.s32.totalorder %s739_s21, 4 }
  0x1c   : > { %p235_p12 = pnand %p579_p10, %p234_p11 }
  0x1d   : > { %s241_s12 = sand.u32 (!%p235_p12), 1, %s731_s19   ;;  %v673_v2 = vld [vmem:[%s932_s1] sm:$0xff] (!%p235_p12)   ;;  %vm353_vm0 = vcmask (!%p235_p12), 130048   ;;  %v741_v4 = vmov (!%p235_p12), 0   ;;  %v674_v5 = vld [vmem:[%s932_s1 + $0x8] sm:$0xff] (!%p235_p12)   ;;  %v675_v7 = vld [vmem:[%s932_s1 + $0x10] sm:$0xff] (!%p235_p12)  }
  0x1e   : > { %238 = sbr.rel (%p235_p12) target bundleno = 501 (0x1f5), region = 77  ;;  %s835_s15 = sshll.u32 (!%p235_p12), %s241_s12, 3  ;;  %608 = vmatprep.mubr.msk.bf16.mxu0 (!%p235_p12), %vm353_vm0, %v673_v2  ;;  %670 = vset.pattern.permute.xlu0 (!%p235_p12), %v741_v4  ;;  %v279_v6 = vld [vmem:[%s933_s2] sm:$0xff] (!%p235_p12)  ;;  %v281_v8 = vld [vmem:[%s933_s2 + $0x10] sm:$0xff] (!%p235_p12)  ;;  %v280_v9 = vld [vmem:[%s933_s2 + $0x8] sm:$0xff] (!%p235_p12)  ;;  %v742_v17 = vmov (!%p235_p12), 0.0  }
  0x1f   : > { %s243_s16 = scalar_lea.vmem (!%p235_p12), [#allocation2], %s835_s15  ;;  %671 = vset.pattern.permute.xlu1 (!%p235_p12), %v741_v4  ;;  %289 = vperm.xlu0 (!%p235_p12), %670, %v279_v6   ;;  %v282_v10 = vld [vmem:[%s933_s2 + $0x18] sm:$0xff] (!%p235_p12)  ;;  %v283_v11 = vld [vmem:[%s933_s2 + $0x20] sm:$0xff] (!%p235_p12)  ;;  %v284_v12 = vld [vmem:[%s933_s2 + $0x28] sm:$0xff] (!%p235_p12)  ;;  %vm743_vm1 = vmmov (!%p235_p12), 0   ;;  %vm450_vm2 = vcmask (!%p235_p12), 523264  }
  0x20   : > { %v672_v3 = vld [vmem:[%s243_s16] sm:$0xff] (!%p235_p12)   ;;  %299 = vperm.xlu1 (!%p235_p12), %671, %v281_v8   ;;  %v676_v13 = vld [vmem:[%s932_s1 + $0x18] sm:$0xff] (!%p235_p12)   ;;  %v285_v14 = vld [vmem:[%s933_s2 + $0x30] sm:$0xff] (!%p235_p12)  ;;  %616 = vmatprep.subr.bf16.mxu1 (!%p235_p12), %v742_v17  ;;  %s593_s14 = sshll.u32 (!%p235_p12), %s573_s22, 7  ;;  %s267_s16 = scalar_lea.vmem (!%p235_p12), [#allocation3], %s835_s15 }
  0x21   : > { %606 = vmatprep.subr.bf16.mxu0 (!%p235_p12), %v672_v3  ;;  %v286_v15 = vld [vmem:[%s933_s2 + $0x38] sm:$0xff] (!%p235_p12)  ;;  %v444_v16 = vld [vmem:[%s935_s4] sm:$0xff] (!%p235_p12)  ;;  %624 = vmatprep.mubr.msk.bf16.mxu1 (!%p235_p12), %vm743_vm1, %v742_v17  ;;  %s509_s17 = sshll.u32 (!%p235_p12), %s267_s16, 4  ;;  %s887_s26 = scalar_lea.hbm (!%p235_p12), %s936_s5, %s593_s14  ;;  %s889_s17 = int_to_ptr.vmem [resolvable:$true] %s509_s17 }
  0x22   : > { %607 = vmatpush3.bf16.msra.mxu0 (!%p235_p12), %v672_v3  ;;  %v439_v54 = vld [vmem:[%s934_s3] sm:$0xf] (!%p235_p12)  ;;  %s496_s22 = scalar_lea.sflag (!%p235_p12), [#allocation4], %s241_s12  ;;  %s677_s15 = scalar_lea.vmem (!%p235_p12), %s889_s17, 128 }
  0x23   : > { %294 = vperm.xlu0 (!%p235_p12), %670, %v280_v9   ;;  %p678_p13 = scmp.ne.s32.totalorder (!%p235_p12), %s889_s17, %s677_s15  ;;  %s744_s30 = smov (!%p235_p12), [#allocation3]  }
  0x24   : > { %304 = vperm.xlu1 (!%p235_p12), %671, %v282_v10   ;;  %s681_s6 = sshll.u32 (!%p235_p12), %s744_s30, 4  ;;  %s682_s6 = int_to_ptr.vmem [resolvable:$false] %s681_s6 }
  0x25   : > { %609 = vmatmul.mubr.msk.bf16.vlgmr.msra.gmra.mrb[0].mxu0 %vm353_vm0, %v674_v5  ;;  %p679_p0 = pnand %p678_p13, %p813_p6  ;;  %s683_s7 = scalar_lea.vmem %s682_s6, 256 }
  0x26   : > { %612 = vmatprep.mubr.msk.bf16.mxu0 %vm353_vm0, %v675_v7  ;;  %p684_p2 = scmp.lt.s32.totalorder %s889_s17, %s682_s6  ;;  %p685_p3 = scmp.lt.s32.totalorder %s683_s7, %s677_s15 }
  0x27   : > { %309 = vperm.xlu0 %670, %v283_v11   ;;  %p680_p1 = pneg %p679_p0 }
  0x28   : > { %314 = vperm.xlu1 %671, %v284_v12   ;;  %p686_p4 = por %p685_p3, %p684_p2 }
  0x2a   : > { %p687_p5 = pnand %p686_p4, %p680_p1 }
  0x2b   : > { %319 = vperm.xlu0 %670, %v285_v14  }
  0x2c   : > { %324 = vperm.xlu1 %671, %v286_v15  }
  0x2d   : > { %613 = vmatmul.mubr.msk.bf16.gmra.mrb[4].mxu0 %vm353_vm0, %v676_v13 }
  0x2f   : > { %447 = vperm.xlu0 %670, %v444_v16  }
  0x9e   : > { %v290_v18 = vpop.permute.xlu0 %289 }
  0x9f   : > { %v300_v19 = vpop.permute.xlu1 %299 }
  0xa2   : > { %v295_v20 = vpop.permute.xlu0 %294 }
  0xa3   : > { %v305_v21 = vpop.permute.xlu1 %304 }
  0xa6   : > { %v310_v25 = vpop.permute.xlu0 %309 }
  0xa7   : > { %v315_v30 = vpop.permute.xlu1 %314 }
  0xaa   : > { %v320_v37 = vpop.permute.xlu0 %319 }
  0xab   : > { %v325_v42 = vpop.permute.xlu1 %324 }
  0xae   : > { %v448_v55 = vpop.permute.xlu0 %447 }
  0xf8   : > { %v610_v22 = vpop.f32.mrb[0].mxu0 }
  0xf9   : > { %v409_v23 = vadd.f32 %v610_v22, %v300_v19  ;;  %v400_v24 = vpop.f32.mrb[1].mxu0 }
  0xfa   : > { %v401_v26 = vadd.f32 %v400_v24, %v290_v18  ;;  %v611_v27 = vpop.f32.mrb[2].mxu0 }
  0xfb   : > { %v412_v28 = vadd.f32 %v611_v27, %v305_v21  ;;  %v403_v29 = vpop.f32.mrb[3].mxu0  ;;  %v433_v32 = vmax.f32 %v409_v23, 0.0 }
  0xfc   : > { %v404_v31 = vadd.f32 %v403_v29, %v295_v20  ;;  %v431_v34 = vmax.f32 %v401_v26, 0.0 }
  0xfd   : > { %v434_v33 = vmax.f32 %v412_v28, 0.0 }
  0xfe   : > { %v432_v35 = vmax.f32 %v404_v31, 0.0 }
  0xff   : > { %v441_v36 = vpack.c.bf16 %v434_v33, %v433_v32 }
 0x100   : > { %v614_v38 = vpop.f32.mrb[4].mxu0  ;;  %v440_v39 = vpack.c.bf16 %v432_v35, %v431_v34 }
 0x101   : > { %v425_v40 = vadd.f32 %v614_v38, %v320_v37  ;;  %v416_v41 = vpop.f32.mrb[5].mxu0 }
 0x102   : > { %v417_v43 = vadd.f32 %v416_v41, %v310_v25  ;;  %v615_v44 = vpop.f32.mrb[6].mxu0  ;;  %617 = vmatpush3.bf16.msra.mxu1 %v440_v39 }
 0x103   : > { %v428_v45 = vadd.f32 %v615_v44, %v325_v42  ;;  %v419_v46 = vpop.f32.mrb[7].mxu0  ;;  %618 = vmatprep.subr.bf16.mxu1 %v742_v17  ;;  %v437_v48 = vmax.f32 %v425_v40, 0.0 }
 0x104   : > { %v420_v47 = vadd.f32 %v419_v46, %v315_v30  ;;  %v435_v50 = vmax.f32 %v417_v43, 0.0 }
 0x105   : > { %v438_v49 = vmax.f32 %v428_v45, 0.0 }
 0x106   : > { %v436_v51 = vmax.f32 %v420_v47, 0.0  ;;  %619 = vmatpush3.bf16.msra.mxu1 %v441_v36 }
 0x107   : > { %v443_v52 = vpack.c.bf16 %v438_v49, %v437_v48  ;;  %620 = vmatprep.subr.bf16.mxu1 %v742_v17 }
 0x108   : > { %v442_v53 = vpack.c.bf16 %v436_v51, %v435_v50 }
 0x10a   : > { %621 = vmatpush3.bf16.msra.mxu1 %v442_v53 }
 0x10b   : > { %622 = vmatprep.subr.bf16.mxu1 %v742_v17 }
 0x10e   : > { %623 = vmatpush3.bf16.msra.mxu1 %v443_v52 }
 0x111   : > { %625 = vmatmul.mubr.msk.bf16.vlgmr.msra.gmra.mrb[0].mxu1 %vm450_vm2, %v439_v54 }
 0x1e4   : > { %v488_v56 = vpop.f32.mrb[0].mxu1 }
 0x1e5   : > { %v489_v57 = vadd.f32 %v488_v56, %v448_v55  ;;  %v626_v58 = vpop.f32.mrb[1].mxu1 }
 0x1e6   : > { %v491_v59 = vpop.f32.mrb[2].mxu1 }
 0x1e7   : > { %494 = vst [vmem:[%s267_s16] sm:$0xff] %v489_v57  ;;  %v627_v60 = vpop.f32.mrb[3].mxu1 }
 0x1e8   : > { %690 = shalt.err (!%p687_p5)
}
 0x1e9   : > { %s691_s12 = scalar_lea.hbm %s887_s26, 128  ;;  %s695_s10 = scalar_lea.hbm %s936_s5, 384 }
 0x1ea   : > { %p692_p7 = scmp.ne.s32.totalorder %s887_s26, %s691_s12  ;;  %p696_p11 = scmp.lt.u32.totalorder %s887_s26, %s936_s5 }
 0x1eb   : > { %p697_p12 = scmp.lt.u32.totalorder %s695_s10, %s691_s12  ;;  %p699_p0 = scmp.lt.u32.totalorder %s691_s12, %s887_s26 }
 0x1ec   : > { %p693_p9 = pnand %p692_p7, %p813_p6 }
 0x1ed   : > { %p698_p13 = por %p697_p12, %p696_p11 }
 0x1ee   : > { %p694_p10 = pneg %p693_p9 }
 0x1ef   : > { %p700_p1 = por %p699_p0, %p698_p13 }
 0x1f1   : > { %p701_p2 = pnand %p700_p1, %p694_p10 }
 0x1f3   : > { %704 = shalt.err (!%p701_p2)
}
 0x1f4   : > { %628 = dma.vmem_to_hbm [thread:$0]  (%p813_p6), %s889_s17, 128, %s887_s26, %s496_s22  }
 0x1f5 PF: > { %p634_p3 = scmp.ge.s32.totalorder %s739_s21, 2  ;;  %s521_s14 = sand.u32 1, %s727_s18  }
 0x1f6   : > { %s522_s16 = scalar_lea.sflag [#allocation4], %s521_s14 }
 0x1f7   : > { %p631_p4 = pnand %p634_p3, %p817_p8 }
 0x1f9   : > { %722 = dma.done.wait (!%p631_p4), %s522_s16, 128  }
 0x1fa   : > { %724 = vsyncadd (!%p631_p4), %s522_s16, 4294967168  ;;  %p15_p5 = scmp.ge.s32.totalorder %s798_s24, 5   ;;  %s939_s18 = smov %s731_s19 }
 0x1fb   : > { %s940_s19 = smov %s735_s20  ;;  %s941_s20 = smov %s811_s27 }
 0x1fc   : > { %s942_s21 = smov %s798_s24  ;;  %17 = sbr.rel (!%p15_p5) target bundleno = 3 (0x3), region = 121 }
 0x203   :  { %527 = vsyncpa [#allocation4], 1 }
 0x204   :  { %529 = vsyncpa [#allocation4 + $0x1], 1 }

</bundles_post_ra>
